<compile_context>
chip_gen: v7x
topology: tpu7x:2x2x1
jax: 0.10.0
libtpu: 0.0.40
codegen_flags: <defaults>
</compile_context>

<pallas_src>
import jax
import jax.numpy as jnp
import numpy as np
from jax import lax
from jax.experimental import pallas as pl
from jax.experimental.pallas import tpu as pltpu

GAMMA = 2.0                      # focal gamma (both focal losses)
ALPHA = 0.25                     # focal alpha (binary focal loss)
EPS = 1e-7                       # dice eps
CLASS_WEIGHTS = (0.6, 0.2, 0.2)  # fixed class weights from the module
_PAD_LOGIT = 60.0                # pad logit magnitude (exact-zero contributions)
_VMEM_LIMIT = 32 * 1024 * 1024   # safe on v5e/v6e/v7x
_ROW_TILE_MAX = 1024             # max rows of 128 lanes per block
_BLOCK_BYTE_BUDGET = 12 * 1024 * 1024  # per-step input bytes (x2 for dbl buffer)


# ---------------------------------------------------------------------------
# Trace-time planning helpers
# ---------------------------------------------------------------------------
def _spatial_plan(n, batch, bytes_per_row):
    """Plan the (rows, 128) layout, row tile R, and megacore group split G."""
    lanes = 128
    rows = -(-n // lanes)                 # ceil(n / 128)
    rows = -(-rows // 8) * 8              # pad rows to a multiple of 8

    r_cap = (_BLOCK_BYTE_BUDGET // max(bytes_per_row, 1)) // 8 * 8
    r_cap = max(8, min(_ROW_TILE_MAX, r_cap))

    if rows <= r_cap:
        R = rows
    else:
        R = 8
        for d in range(r_cap, 7, -8):     # largest multiple-of-8 divisor
            if rows % d == 0:
                R = d
                break
        if R < 128 <= r_cap:              # pathological rows: pad to tile
            R = min(256, r_cap)
            rows = -(-rows // R) * R
    tiles = rows // R

    # Megacore: a second "parallel" axis so a lone / odd batch still uses 2 TCs.
    if tiles % 2 == 0:
        G = 2
    elif batch % 2 == 1 and tiles == 1 and R % 16 == 0 and R >= 64:
        R //= 2
        tiles = 2
        G = 2
    else:
        G = 1
    T = tiles // G
    pad = rows * lanes - n
    return lanes, rows, pad, R, G, T


def _bytes_per_row(arrays):
    return sum(a.shape[1] * 128 * a.dtype.itemsize for a in arrays)


def _layout(t, rows, lanes, pad_value=0.0, class0_pad_value=None):
    """(B, C, H, W) -> (B, C, rows, lanes), padding the flat spatial axis."""
    B, C, H, W = t.shape
    n = H * W
    flat = t.reshape(B, C, n)
    pad = rows * lanes - n
    if pad:
        fill = jnp.full((B, C, pad), pad_value, dtype=t.dtype)
        if class0_pad_value is not None:
            fill = fill.at[:, 0, :].set(jnp.asarray(class0_pad_value, dtype=t.dtype))
        flat = jnp.concatenate([flat, fill], axis=-1)
    return flat.reshape(B, C, rows, lanes)


# ---------------------------------------------------------------------------
# In-kernel math helpers (pure VPU/EUP; no XLU, no MXU)
# ---------------------------------------------------------------------------
def _refined_reciprocal(x):
    """EUP approx reciprocal + one Newton step (~f32 accuracy, no divide)."""
    inv = pl.reciprocal(x, approx=True)
    return inv * (2.0 - x * inv)


def _fold_rows(a):
    """(r, L) -> (8, L) partial sum with vreg-wise VPU adds (no XLU)."""
    r = a.shape[0]
    if r % 8 == 0 and r > 8:
        out = a[0:8]
        for i in range(1, r // 8):
            out = out + a[i * 8:(i + 1) * 8]
        return out
    return a


def _det_contrib(x, y):
    """Weighted softmax focal CE + per-class dice partial sums on a sub-slab."""
    C = x.shape[0]
    m = x[0]
    for c in range(1, C):
        m = jnp.maximum(m, x[c])
    d = [x[c] - m for c in range(C)]
    ex = [jnp.exp(d[c]) for c in range(C)]
    denom = ex[0]
    for c in range(1, C):
        denom = denom + ex[c]
    inv = _refined_reciprocal(denom)
    logd = jnp.log(denom)

    # soft-target weighted CE (log_softmax is idempotent wrt the torch double
    # application), focal gamma == 2 -> explicit square.
    ce = CLASS_WEIGHTS[0] * (y[0] * (d[0] - logd))
    for c in range(1, C):
        ce = ce + CLASS_WEIGHTS[c] * (y[c] * (d[c] - logd))
    ce = -ce
    t = 1.0 - jnp.exp(-ce)

    inter, psum, ysum = [], [], []
    for c in range(C):
        p_c = ex[c] * inv
        inter.append(_fold_rows(y[c] * p_c))
        psum.append(_fold_rows(p_c))
        ysum.append(_fold_rows(y[c]))
    return _fold_rows(t * t * ce), tuple(inter), tuple(psum), tuple(ysum)


def _seg_contrib(x, y):
    """Binary focal CE (on sigmoid) + per-channel dice partial sums."""
    Cs = x.shape[0]
    e = jnp.exp(-jnp.abs(x))
    lg = jnp.log(1.0 + e)
    sp_pos = jnp.maximum(x, 0.0) + lg          # -log(1 - p)
    sp_neg = jnp.maximum(-x, 0.0) + lg         # -log(p)
    inv = _refined_reciprocal(1.0 + e)
    p = jnp.where(x >= 0.0, inv, e * inv)      # sigmoid(x)

    # PyTorch binary_cross_entropy clamps log at -100.
    bce = y * jnp.minimum(sp_neg, 100.0) + (1.0 - y) * jnp.minimum(sp_pos, 100.0)
    t = 1.0 - jnp.exp(-bce)
    loss = t * t * bce * (ALPHA * y + (1.0 - ALPHA) * (1.0 - y))

    tot = loss[0]
    for c in range(1, Cs):
        tot = tot + loss[c]
    inter = tuple(_fold_rows(y[c] * p[c]) for c in range(Cs))
    psum = tuple(_fold_rows(p[c]) for c in range(Cs))
    ysum = tuple(_fold_rows(y[c]) for c in range(Cs))
    return _fold_rows(tot), inter, psum, ysum


def _l1_contrib(a, b):
    d = jnp.abs(a - b)
    tot = d[0]
    for c in range(1, d.shape[0]):
        tot = tot + d[c]
    return _fold_rows(tot)


# ---------------------------------------------------------------------------
# Kernel factory
# ---------------------------------------------------------------------------
def _make_kernel(*, sub, n_sub, acc_r, lanes, has_det, has_rec, has_seg, C, Cs):
    n_acc = (1 + 3 * C) * int(has_det) + int(has_rec) + (1 + 3 * Cs) * int(has_seg)

    def kernel(*refs):
        pos = 0
        dx = dy = ra = rb = sx = sy = None
        if has_det:
            dx, dy = refs[pos], refs[pos + 1]
            pos += 2
        if has_rec:
            ra, rb = refs[pos], refs[pos + 1]
            pos += 2
        if has_seg:
            sx, sy = refs[pos], refs[pos + 1]
            pos += 2
        outs = refs[pos:]

        @pl.when(pl.program_id(2) == 0)
        def _init():
            for o in outs:
                o[...] = jnp.zeros_like(o)

        def step(load):
            parts = []
            if has_det:
                ce, inter, psum, ysum = _det_contrib(load(dx), load(dy))
                parts += [ce, *inter, *psum, *ysum]
            if has_rec:
                parts.append(_l1_contrib(load(ra), load(rb)))
            if has_seg:
                ce, inter, psum, ysum = _seg_contrib(load(sx), load(sy))
                parts += [ce, *inter, *psum, *ysum]
            return parts

        if n_sub == 1:
            # Small block: process it in one shot (intermediates already tiny).
            acc = step(lambda r: r[0].astype(jnp.float32))
        else:
            # Stream over sub-row slabs so intermediates stay in vregs (no
            # full-block f32 temporaries / VMEM spill traffic).
            def body(i, carry):
                start = pl.multiple_of(i * sub, sub)
                parts = step(
                    lambda r: r[0, :, pl.ds(start, sub), :].astype(jnp.float32))
                return tuple(c + p for c, p in zip(carry, parts))

            init = tuple(jnp.zeros((acc_r, lanes), jnp.float32)
                         for _ in range(n_acc))
            acc = lax.fori_loop(0, n_sub, body, init)

        k = 0
        o = 0
        if has_det:
            outs[o][0] += acc[k]
            k += 1
            o += 1
            for _ in range(3):                 # inter, psum, ysum
                for c in range(C):
                    outs[o][0, c] += acc[k]
                    k += 1
                o += 1
        if has_rec:
            outs[o][0] += acc[k]
            k += 1
            o += 1
        if has_seg:
            outs[o][0] += acc[k]
            k += 1
            o += 1
            for _ in range(3):
                for c in range(Cs):
                    outs[o][0, c] += acc[k]
                    k += 1
                o += 1

    return kernel


# ---------------------------------------------------------------------------
# pallas_call wrapper
# ---------------------------------------------------------------------------
def _run_loss_pass(det=None, rec=None, seg=None, *, lanes, R, G, T):
    has_det, has_rec, has_seg = det is not None, rec is not None, seg is not None
    first = (det or rec or seg)[0]
    B = first.shape[0]
    C = det[0].shape[1] if has_det else 0
    Cs = seg[0].shape[1] if has_seg else 0
    Cr = rec[0].shape[1] if has_rec else 0

    acc_r = 8
    sub = 16 if R % 16 == 0 else 8
    n_sub = R // sub

    def data_spec(Cx):
        return pl.BlockSpec((1, Cx, R, lanes),
                            lambda b, g, t: (b, 0, g * T + t, 0))

    vec_spec = pl.BlockSpec((1, acc_r, lanes),
                            lambda b, g, t: (b * G + g, 0, 0))

    def cls_spec(Cx):
        return pl.BlockSpec((1, Cx, acc_r, lanes),
                            lambda b, g, t: (b * G + g, 0, 0, 0))

    vec_shape = jax.ShapeDtypeStruct((B * G, acc_r, lanes), jnp.float32)

    def cls_shape(Cx):
        return jax.ShapeDtypeStruct((B * G, Cx, acc_r, lanes), jnp.float32)

    operands, in_specs, out_shapes, out_specs = [], [], [], []
    if has_det:
        operands += list(det)
        in_specs += [data_spec(C)] * 2
        out_shapes += [vec_shape, cls_shape(C), cls_shape(C), cls_shape(C)]
        out_specs += [vec_spec, cls_spec(C), cls_spec(C), cls_spec(C)]
    if has_rec:
        operands += list(rec)
        in_specs += [data_spec(Cr)] * 2
        out_shapes += [vec_shape]
        out_specs += [vec_spec]
    if has_seg:
        operands += list(seg)
        in_specs += [data_spec(Cs)] * 2
        out_shapes += [vec_shape, cls_shape(Cs), cls_shape(Cs), cls_shape(Cs)]
        out_specs += [vec_spec, cls_spec(Cs), cls_spec(Cs), cls_spec(Cs)]

    kernel = _make_kernel(sub=sub, n_sub=n_sub, acc_r=acc_r, lanes=lanes,
                          has_det=has_det, has_rec=has_rec, has_seg=has_seg,
                          C=C, Cs=Cs)
    return pl.pallas_call(
        kernel,
        out_shape=tuple(out_shapes),
        grid=(B, G, T),
        in_specs=in_specs,
        out_specs=tuple(out_specs),
        compiler_params=pltpu.CompilerParams(
            dimension_semantics=("parallel", "parallel", "arbitrary"),
            vmem_limit_bytes=_VMEM_LIMIT),
    )(*operands)


def _dice(inter_acc, psum_acc, ysum_acc, psum0_corr=0.0):
    inter = jnp.sum(inter_acc, axis=(0, 2, 3))
    psum = jnp.sum(psum_acc, axis=(0, 2, 3))
    ysum = jnp.sum(ysum_acc, axis=(0, 2, 3))
    if psum0_corr:
        psum = psum.at[0].add(-psum0_corr)       # remove padded-pixel prob mass
    mask = (ysum > 0).astype(jnp.float32)
    return jnp.mean((1.0 - 2.0 * inter / jnp.maximum(ysum + psum, EPS)) * mask)


def _standalone_l1(a, b):
    B, _, H, W = a.shape
    lanes, rows, _, R, G, T = _spatial_plan(H * W, B, _bytes_per_row([a, b]))
    ra = _layout(a, rows, lanes, 0.0)
    rb = _layout(b, rows, lanes, 0.0)
    (acc,) = _run_loss_pass(rec=(ra, rb), lanes=lanes, R=R, G=G, T=T)
    return jnp.sum(acc) / a.size


def _standalone_seg(logit_seg, segmap):
    B, _, H, W = logit_seg.shape
    lanes, rows, _, R, G, T = _spatial_plan(H * W, B,
                                            _bytes_per_row([logit_seg, segmap]))
    sx = _layout(logit_seg, rows, lanes, -_PAD_LOGIT)
    sy = _layout(segmap, rows, lanes, 0.0)
    ce_acc, inter, psum, ysum = _run_loss_pass(seg=(sx, sy), lanes=lanes,
                                               R=R, G=G, T=T)
    return jnp.sum(ce_acc) / logit_seg.size, _dice(inter, psum, ysum)


def cell_det_seg_rec_poi_loss(logit_det, logit_seg, logit_rec, logit_poi,
                              cell_gt, tissue_segmap, image, poi_gt):
    assert logit_det.shape == cell_gt.shape
    assert logit_seg.shape == tissue_segmap.shape
    assert logit_rec.shape == image.shape

    B, C, H, W = logit_det.shape
    assert C == len(CLASS_WEIGHTS)
    n_det = H * W

    fuse_rec = logit_rec.shape == logit_det.shape
    Bs, _, Hs, Ws = logit_seg.shape
    fuse_seg = (Bs == B) and (Hs * Ws == n_det)

    streams = [logit_det, cell_gt]
    if fuse_rec:
        streams += [logit_rec, image]
    if fuse_seg:
        streams += [logit_seg, tissue_segmap]
    lanes, rows, pad, R, G, T = _spatial_plan(n_det, B, _bytes_per_row(streams))

    # Pad values: det pad pixel -> softmax == (1, 0, 0) and zero CE; seg pad
    # pixel -> sigmoid ~ 0 and zero BCE; rec pads 0 on both sides -> zero L1.
    det = (_layout(logit_det, rows, lanes, -_PAD_LOGIT, _PAD_LOGIT),
           _layout(cell_gt, rows, lanes, 0.0))
    rec = (_layout(logit_rec, rows, lanes, 0.0),
           _layout(image, rows, lanes, 0.0)) if fuse_rec else None
    seg = (_layout(logit_seg, rows, lanes, -_PAD_LOGIT),
           _layout(tissue_segmap, rows, lanes, 0.0)) if fuse_seg else None

    outs = _run_loss_pass(det=det, rec=rec, seg=seg, lanes=lanes, R=R, G=G, T=T)

    i = 0
    det_ce_acc, det_inter, det_psum, det_ysum = outs[i:i + 4]
    i += 4
    l1_acc = None
    if fuse_rec:
        l1_acc = outs[i]
        i += 1
    if fuse_seg:
        seg_ce_acc, seg_inter, seg_psum, seg_ysum = outs[i:i + 4]
        i += 4

    n_pix = B * H * W
    det_ce = jnp.sum(det_ce_acc) / n_pix
    det_dice = _dice(det_inter, det_psum, det_ysum, psum0_corr=float(B * pad))

    rec_l1 = (jnp.sum(l1_acc) / logit_rec.size) if fuse_rec \
        else _standalone_l1(logit_rec, image)

    if fuse_seg:
        seg_ce = jnp.sum(seg_ce_acc) / logit_seg.size
        seg_dice = _dice(seg_inter, seg_psum, seg_ysum)
    else:
        seg_ce, seg_dice = _standalone_seg(logit_seg, tissue_segmap)

    # 32-element MSE: plain JAX (a Pallas launch here is pure overhead).
    poi_l2 = jnp.mean((logit_poi.astype(jnp.float32)
                       - poi_gt.astype(jnp.float32)) ** 2)

    return jnp.stack([det_ce + det_dice, seg_ce + seg_dice, rec_l1, poi_l2])


# ---------------------------------------------------------------------------
# Pure-JAX reference (mirrors the PyTorch semantics)
# ---------------------------------------------------------------------------
def _reference(logit_det, logit_seg, logit_rec, logit_poi,
               cell_gt, tissue_segmap, image, poi_gt):
    def dice(y_true, y_pred):
        mask = (jnp.sum(y_true, axis=(0, 2, 3)) > 0).astype(jnp.float32)
        inter = jnp.sum(y_true * y_pred, axis=(0, 2, 3))
        card = jnp.sum(y_true + y_pred, axis=(0, 2, 3))
        return jnp.mean((1.0 - 2.0 * inter / jnp.maximum(card, EPS)) * mask)

    w = jnp.array(CLASS_WEIGHTS, jnp.float32).reshape(1, 3, 1, 1)
    logp = jax.nn.log_softmax(logit_det, axis=1)
    ce = -jnp.sum(w * cell_gt * logp, axis=1)
    det_ce = jnp.mean((1.0 - jnp.exp(-ce)) ** GAMMA * ce)
    det_dice = dice(cell_gt, jax.nn.softmax(logit_det, axis=1))

    ps = jax.nn.sigmoid(logit_seg)
    bce = -(tissue_segmap * jnp.maximum(jnp.log(ps), -100.0)
            + (1.0 - tissue_segmap) * jnp.maximum(jnp.log(1.0 - ps), -100.0))
    focal = (1.0 - jnp.exp(-bce)) ** GAMMA * bce
    seg_ce = jnp.mean(focal * (ALPHA * tissue_segmap
                               + (1.0 - ALPHA) * (1.0 - tissue_segmap)))
    seg_dice = dice(tissue_segmap, ps)

    rec_l1 = jnp.mean(jnp.abs(logit_rec - image))
    poi_l2 = jnp.mean((logit_poi - poi_gt) ** 2)
    return jnp.stack([det_ce + det_dice, seg_ce + seg_dice, rec_l1, poi_l2])


def _make_inputs(key, B, H, W):
    ks = jax.random.split(key, 8)
    logit_det = jax.random.normal(ks[0], (B, 3, H, W), jnp.float32)
    cls = jax.random.randint(ks[1], (B, H, W), 0, 3)
    cell_gt = jnp.transpose(jax.nn.one_hot(cls, 3, dtype=jnp.float32), (0, 3, 1, 2))
    logit_seg = jax.random.normal(ks[2], (B, 1, H, W), jnp.float32)
    tissue_segmap = jax.random.bernoulli(ks[3], 0.5, (B, 1, H, W)).astype(jnp.float32)
    logit_rec = jax.random.normal(ks[4], (B, 3, H, W), jnp.float32)
    image = jax.random.uniform(ks[5], (B, 3, H, W), jnp.float32)
    logit_poi = jax.random.normal(ks[6], (B, 8, 2), jnp.float32)
    poi_gt = jax.random.uniform(ks[7], (B, 8, 2), jnp.float32)
    return (logit_det, logit_seg, logit_rec, logit_poi,
            cell_gt, tissue_segmap, image, poi_gt)


if __name__ == "__main__":
    key = jax.random.PRNGKey(0)
    k1, k2 = jax.random.split(key)
    loss_fn = jax.jit(cell_det_seg_rec_poi_loss)

    # Config 1: small odd-ish spatial size (exercises the row-padding path).
    # Config 2: larger size with B=1 (exercises the fori sub-slab streaming
    # path and the G=2 megacore row-group split).
    for k, (B, H, W) in ((k1, (2, 16, 16)), (k2, (1, 128, 128))):
        args = _make_inputs(k, B, H, W)
        out = jax.block_until_ready(loss_fn(*args))
        ref = _reference(*args)
        np.testing.assert_allclose(np.asarray(out), np.asarray(ref),
                                   rtol=2e-3, atol=1e-5)
    print("KERNEL_OK")
</pallas_src>

<mosaic_0001>
module attributes {stable_mosaic.version = 11 : i64} {
  func.func @kernel(%arg0: i32, %arg1: i32, %arg2: i32, %arg3: memref<1x3x8x128xf32, #tpu.memory_space<vmem>>, %arg4: memref<1x3x8x128xf32, #tpu.memory_space<vmem>>, %arg5: memref<1x3x8x128xf32, #tpu.memory_space<vmem>>, %arg6: memref<1x3x8x128xf32, #tpu.memory_space<vmem>>, %arg7: memref<1x1x8x128xf32, #tpu.memory_space<vmem>>, %arg8: memref<1x1x8x128xf32, #tpu.memory_space<vmem>>, %arg9: memref<1x8x128xf32, #tpu.memory_space<vmem>>, %arg10: memref<1x3x8x128xf32, #tpu.memory_space<vmem>>, %arg11: memref<1x3x8x128xf32, #tpu.memory_space<vmem>>, %arg12: memref<1x3x8x128xf32, #tpu.memory_space<vmem>>, %arg13: memref<1x8x128xf32, #tpu.memory_space<vmem>>, %arg14: memref<1x8x128xf32, #tpu.memory_space<vmem>>, %arg15: memref<1x1x8x128xf32, #tpu.memory_space<vmem>>, %arg16: memref<1x1x8x128xf32, #tpu.memory_space<vmem>>, %arg17: memref<1x1x8x128xf32, #tpu.memory_space<vmem>>) attributes {dimension_semantics = [#tpu.dimension_semantics<parallel>, #tpu.dimension_semantics<parallel>, #tpu.dimension_semantics<arbitrary>], iteration_bounds = array<i64: 2, 1, 1>, scalar_prefetch = 0 : i64, scratch_operands = 0 : i64, tpu.core_type = #tpu.core_type<tc>, window_params = [{transform_indices = @transform_0, window_bounds = array<i64: 1, 3, 8, 128>}, {transform_indices = @transform_1, window_bounds = array<i64: 1, 3, 8, 128>}, {transform_indices = @transform_2, window_bounds = array<i64: 1, 3, 8, 128>}, {transform_indices = @transform_3, window_bounds = array<i64: 1, 3, 8, 128>}, {transform_indices = @transform_4, window_bounds = array<i64: 1, 1, 8, 128>}, {transform_indices = @transform_5, window_bounds = array<i64: 1, 1, 8, 128>}, {transform_indices = @transform_6, window_bounds = array<i64: 1, 8, 128>}, {transform_indices = @transform_7, window_bounds = array<i64: 1, 3, 8, 128>}, {transform_indices = @transform_8, window_bounds = array<i64: 1, 3, 8, 128>}, {transform_indices = @transform_9, window_bounds = array<i64: 1, 3, 8, 128>}, {transform_indices = @transform_10, window_bounds = array<i64: 1, 8, 128>}, {transform_indices = @transform_11, window_bounds = array<i64: 1, 8, 128>}, {transform_indices = @transform_12, window_bounds = array<i64: 1, 1, 8, 128>}, {transform_indices = @transform_13, window_bounds = array<i64: 1, 1, 8, 128>}, {transform_indices = @transform_14, window_bounds = array<i64: 1, 1, 8, 128>}]} {
    %c0_i32 = arith.constant 0 : i32
    %0 = arith.cmpi eq, %arg2, %c0_i32 : i32
    %1 = arith.extui %0 : i1 to i32
    %c0_i32_0 = arith.constant 0 : i32
    %2 = arith.cmpi ne, %1, %c0_i32_0 : i32
    scf.if %2 {
      %cst_158 = arith.constant 0.000000e+00 : f32
      %246 = vector.broadcast %cst_158 : f32 to vector<1x8x128xf32>
      %c0_159 = arith.constant 0 : index
      %c0_160 = arith.constant 0 : index
      %c0_161 = arith.constant 0 : index
      %247 = vector.load %arg9[%c0_159, %c0_160, %c0_161] : memref<1x8x128xf32, #tpu.memory_space<vmem>>, vector<1x8x128xf32>
      tpu.vector_store %arg9[%c0_159, %c0_160, %c0_161], %246 {strides = array<i32>} : memref<1x8x128xf32, #tpu.memory_space<vmem>>, vector<1x8x128xf32>,
      %cst_162 = arith.constant 0.000000e+00 : f32
      %248 = vector.broadcast %cst_162 : f32 to vector<1x3x8x128xf32>
      %c0_163 = arith.constant 0 : index
      %c0_164 = arith.constant 0 : index
      %c0_165 = arith.constant 0 : index
      %c0_166 = arith.constant 0 : index
      %249 = vector.load %arg10[%c0_163, %c0_164, %c0_165, %c0_166] : memref<1x3x8x128xf32, #tpu.memory_space<vmem>>, vector<1x3x8x128xf32>
      tpu.vector_store %arg10[%c0_163, %c0_164, %c0_165, %c0_166], %248 {strides = array<i32>} : memref<1x3x8x128xf32, #tpu.memory_space<vmem>>, vector<1x3x8x128xf32>,
      %cst_167 = arith.constant 0.000000e+00 : f32
      %250 = vector.broadcast %cst_167 : f32 to vector<1x3x8x128xf32>
      %c0_168 = arith.constant 0 : index
      %c0_169 = arith.constant 0 : index
      %c0_170 = arith.constant 0 : index
      %c0_171 = arith.constant 0 : index
      %251 = vector.load %arg11[%c0_168, %c0_169, %c0_170, %c0_171] : memref<1x3x8x128xf32, #tpu.memory_space<vmem>>, vector<1x3x8x128xf32>
      tpu.vector_store %arg11[%c0_168, %c0_169, %c0_170, %c0_171], %250 {strides = array<i32>} : memref<1x3x8x128xf32, #tpu.memory_space<vmem>>, vector<1x3x8x128xf32>,
      %cst_172 = arith.constant 0.000000e+00 : f32
      %252 = vector.broadcast %cst_172 : f32 to vector<1x3x8x128xf32>
      %c0_173 = arith.constant 0 : index
      %c0_174 = arith.constant 0 : index
      %c0_175 = arith.constant 0 : index
      %c0_176 = arith.constant 0 : index
      %253 = vector.load %arg12[%c0_173, %c0_174, %c0_175, %c0_176] : memref<1x3x8x128xf32, #tpu.memory_space<vmem>>, vector<1x3x8x128xf32>
      tpu.vector_store %arg12[%c0_173, %c0_174, %c0_175, %c0_176], %252 {strides = array<i32>} : memref<1x3x8x128xf32, #tpu.memory_space<vmem>>, vector<1x3x8x128xf32>,
      %cst_177 = arith.constant 0.000000e+00 : f32
      %254 = vector.broadcast %cst_177 : f32 to vector<1x8x128xf32>
      %c0_178 = arith.constant 0 : index
      %c0_179 = arith.constant 0 : index
      %c0_180 = arith.constant 0 : index
      %255 = vector.load %arg13[%c0_178, %c0_179, %c0_180] : memref<1x8x128xf32, #tpu.memory_space<vmem>>, vector<1x8x128xf32>
      tpu.vector_store %arg13[%c0_178, %c0_179, %c0_180], %254 {strides = array<i32>} : memref<1x8x128xf32, #tpu.memory_space<vmem>>, vector<1x8x128xf32>,
      %cst_181 = arith.constant 0.000000e+00 : f32
      %256 = vector.broadcast %cst_181 : f32 to vector<1x8x128xf32>
      %c0_182 = arith.constant 0 : index
      %c0_183 = arith.constant 0 : index
      %c0_184 = arith.constant 0 : index
      %257 = vector.load %arg14[%c0_182, %c0_183, %c0_184] : memref<1x8x128xf32, #tpu.memory_space<vmem>>, vector<1x8x128xf32>
      tpu.vector_store %arg14[%c0_182, %c0_183, %c0_184], %256 {strides = array<i32>} : memref<1x8x128xf32, #tpu.memory_space<vmem>>, vector<1x8x128xf32>,
      %cst_185 = arith.constant 0.000000e+00 : f32
      %258 = vector.broadcast %cst_185 : f32 to vector<1x1x8x128xf32>
      %c0_186 = arith.constant 0 : index
      %c0_187 = arith.constant 0 : index
      %c0_188 = arith.constant 0 : index
      %c0_189 = arith.constant 0 : index
      %259 = vector.load %arg15[%c0_186, %c0_187, %c0_188, %c0_189] : memref<1x1x8x128xf32, #tpu.memory_space<vmem>>, vector<1x1x8x128xf32>
      tpu.vector_store %arg15[%c0_186, %c0_187, %c0_188, %c0_189], %258 {strides = array<i32>} : memref<1x1x8x128xf32, #tpu.memory_space<vmem>>, vector<1x1x8x128xf32>,
      %cst_190 = arith.constant 0.000000e+00 : f32
      %260 = vector.broadcast %cst_190 : f32 to vector<1x1x8x128xf32>
      %c0_191 = arith.constant 0 : index
      %c0_192 = arith.constant 0 : index
      %c0_193 = arith.constant 0 : index
      %c0_194 = arith.constant 0 : index
      %261 = vector.load %arg16[%c0_191, %c0_192, %c0_193, %c0_194] : memref<1x1x8x128xf32, #tpu.memory_space<vmem>>, vector<1x1x8x128xf32>
      tpu.vector_store %arg16[%c0_191, %c0_192, %c0_193, %c0_194], %260 {strides = array<i32>} : memref<1x1x8x128xf32, #tpu.memory_space<vmem>>, vector<1x1x8x128xf32>,
      %cst_195 = arith.constant 0.000000e+00 : f32
      %262 = vector.broadcast %cst_195 : f32 to vector<1x1x8x128xf32>
      %c0_196 = arith.constant 0 : index
      %c0_197 = arith.constant 0 : index
      %c0_198 = arith.constant 0 : index
      %c0_199 = arith.constant 0 : index
      %263 = vector.load %arg17[%c0_196, %c0_197, %c0_198, %c0_199] : memref<1x1x8x128xf32, #tpu.memory_space<vmem>>, vector<1x1x8x128xf32>
      tpu.vector_store %arg17[%c0_196, %c0_197, %c0_198, %c0_199], %262 {strides = array<i32>} : memref<1x1x8x128xf32, #tpu.memory_space<vmem>>, vector<1x1x8x128xf32>,
    } else {
    }
    %c0 = arith.constant 0 : index
    %c0_1 = arith.constant 0 : index
    %c0_2 = arith.constant 0 : index
    %c0_3 = arith.constant 0 : index
    %3 = vector.load %arg3[%c0, %c0_1, %c0_2, %c0_3] : memref<1x3x8x128xf32, #tpu.memory_space<vmem>>, vector<1x3x8x128xf32>
    %4 = vector.shape_cast %3 : vector<1x3x8x128xf32> to vector<3x8x128xf32>
    %c0_4 = arith.constant 0 : index
    %c0_5 = arith.constant 0 : index
    %c0_6 = arith.constant 0 : index
    %c0_7 = arith.constant 0 : index
    %5 = vector.load %arg4[%c0_4, %c0_5, %c0_6, %c0_7] : memref<1x3x8x128xf32, #tpu.memory_space<vmem>>, vector<1x3x8x128xf32>
    %6 = vector.shape_cast %5 : vector<1x3x8x128xf32> to vector<3x8x128xf32>
    %7 = vector.extract_strided_slice %4 {offsets = [0, 0, 0], sizes = [1, 8, 128], strides = [1, 1, 1]} : vector<3x8x128xf32> to vector<1x8x128xf32>
    %8 = vector.shape_cast %7 : vector<1x8x128xf32> to vector<8x128xf32>
    %9 = vector.extract_strided_slice %4 {offsets = [1, 0, 0], sizes = [1, 8, 128], strides = [1, 1, 1]} : vector<3x8x128xf32> to vector<1x8x128xf32>
    %10 = vector.shape_cast %9 : vector<1x8x128xf32> to vector<8x128xf32>
    %11 = arith.maximumf %8, %10 : vector<8x128xf32>
    %12 = vector.extract_strided_slice %4 {offsets = [2, 0, 0], sizes = [1, 8, 128], strides = [1, 1, 1]} : vector<3x8x128xf32> to vector<1x8x128xf32>
    %13 = vector.shape_cast %12 : vector<1x8x128xf32> to vector<8x128xf32>
    %14 = arith.maximumf %11, %13 : vector<8x128xf32>
    %15 = vector.extract_strided_slice %4 {offsets = [0, 0, 0], sizes = [1, 8, 128], strides = [1, 1, 1]} : vector<3x8x128xf32> to vector<1x8x128xf32>
    %16 = vector.shape_cast %15 : vector<1x8x128xf32> to vector<8x128xf32>
    %17 = arith.subf %16, %14 : vector<8x128xf32>
    %18 = vector.extract_strided_slice %4 {offsets = [1, 0, 0], sizes = [1, 8, 128], strides = [1, 1, 1]} : vector<3x8x128xf32> to vector<1x8x128xf32>
    %19 = vector.shape_cast %18 : vector<1x8x128xf32> to vector<8x128xf32>
    %20 = arith.subf %19, %14 : vector<8x128xf32>
    %21 = vector.extract_strided_slice %4 {offsets = [2, 0, 0], sizes = [1, 8, 128], strides = [1, 1, 1]} : vector<3x8x128xf32> to vector<1x8x128xf32>
    %22 = vector.shape_cast %21 : vector<1x8x128xf32> to vector<8x128xf32>
    %23 = arith.subf %22, %14 : vector<8x128xf32>
    %24 = math.exp %17 : vector<8x128xf32>
    %25 = math.exp %20 : vector<8x128xf32>
    %26 = math.exp %23 : vector<8x128xf32>
    %27 = arith.addf %24, %25 : vector<8x128xf32>
    %28 = arith.addf %27, %26 : vector<8x128xf32>
    %29 = tpu.reciprocal %28 {approx = true} : vector<8x128xf32> -> vector<8x128xf32>
    %30 = arith.mulf %28, %29 : vector<8x128xf32>
    %cst = arith.constant 2.000000e+00 : f32
    %31 = vector.broadcast %cst : f32 to vector<8x128xf32>
    %32 = arith.subf %31, %30 : vector<8x128xf32>
    %33 = arith.mulf %29, %32 : vector<8x128xf32>
    %34 = math.log %28 : vector<8x128xf32>
    %35 = vector.extract_strided_slice %6 {offsets = [0, 0, 0], sizes = [1, 8, 128], strides = [1, 1, 1]} : vector<3x8x128xf32> to vector<1x8x128xf32>
    %36 = vector.shape_cast %35 : vector<1x8x128xf32> to vector<8x128xf32>
    %37 = arith.subf %17, %34 : vector<8x128xf32>
    %38 = arith.mulf %36, %37 : vector<8x128xf32>
    %cst_8 = arith.constant 6.000000e-01 : f32
    %39 = vector.broadcast %cst_8 : f32 to vector<8x128xf32>
    %40 = arith.mulf %39, %38 : vector<8x128xf32>
    %41 = vector.extract_strided_slice %6 {offsets = [1, 0, 0], sizes = [1, 8, 128], strides = [1, 1, 1]} : vector<3x8x128xf32> to vector<1x8x128xf32>
    %42 = vector.shape_cast %41 : vector<1x8x128xf32> to vector<8x128xf32>
    %43 = arith.subf %20, %34 : vector<8x128xf32>
    %44 = arith.mulf %42, %43 : vector<8x128xf32>
    %cst_9 = arith.constant 2.000000e-01 : f32
    %45 = vector.broadcast %cst_9 : f32 to vector<8x128xf32>
    %46 = arith.mulf %45, %44 : vector<8x128xf32>
    %47 = arith.addf %40, %46 : vector<8x128xf32>
    %48 = vector.extract_strided_slice %6 {offsets = [2, 0, 0], sizes = [1, 8, 128], strides = [1, 1, 1]} : vector<3x8x128xf32> to vector<1x8x128xf32>
    %49 = vector.shape_cast %48 : vector<1x8x128xf32> to vector<8x128xf32>
    %50 = arith.subf %23, %34 : vector<8x128xf32>
    %51 = arith.mulf %49, %50 : vector<8x128xf32>
    %cst_10 = arith.constant 2.000000e-01 : f32
    %52 = vector.broadcast %cst_10 : f32 to vector<8x128xf32>
    %53 = arith.mulf %52, %51 : vector<8x128xf32>
    %54 = arith.addf %47, %53 : vector<8x128xf32>
    %cst_11 = arith.constant 0.000000e+00 : f32
    %55 = vector.broadcast %cst_11 : f32 to vector<8x128xf32>
    %56 = arith.subf %55, %54 : vector<8x128xf32>
    %cst_12 = arith.constant 0.000000e+00 : f32
    %57 = vector.broadcast %cst_12 : f32 to vector<8x128xf32>
    %58 = arith.subf %57, %56 : vector<8x128xf32>
    %59 = math.exp %58 : vector<8x128xf32>
    %cst_13 = arith.constant 1.000000e+00 : f32
    %60 = vector.broadcast %cst_13 : f32 to vector<8x128xf32>
    %61 = arith.subf %60, %59 : vector<8x128xf32>
    %62 = arith.mulf %24, %33 : vector<8x128xf32>
    %63 = vector.extract_strided_slice %6 {offsets = [0, 0, 0], sizes = [1, 8, 128], strides = [1, 1, 1]} : vector<3x8x128xf32> to vector<1x8x128xf32>
    %64 = vector.shape_cast %63 : vector<1x8x128xf32> to vector<8x128xf32>
    %65 = arith.mulf %64, %62 : vector<8x128xf32>
    %66 = vector.extract_strided_slice %6 {offsets = [0, 0, 0], sizes = [1, 8, 128], strides = [1, 1, 1]} : vector<3x8x128xf32> to vector<1x8x128xf32>
    %67 = vector.shape_cast %66 : vector<1x8x128xf32> to vector<8x128xf32>
    %68 = arith.mulf %25, %33 : vector<8x128xf32>
    %69 = vector.extract_strided_slice %6 {offsets = [1, 0, 0], sizes = [1, 8, 128], strides = [1, 1, 1]} : vector<3x8x128xf32> to vector<1x8x128xf32>
    %70 = vector.shape_cast %69 : vector<1x8x128xf32> to vector<8x128xf32>
    %71 = arith.mulf %70, %68 : vector<8x128xf32>
    %72 = vector.extract_strided_slice %6 {offsets = [1, 0, 0], sizes = [1, 8, 128], strides = [1, 1, 1]} : vector<3x8x128xf32> to vector<1x8x128xf32>
    %73 = vector.shape_cast %72 : vector<1x8x128xf32> to vector<8x128xf32>
    %74 = arith.mulf %26, %33 : vector<8x128xf32>
    %75 = vector.extract_strided_slice %6 {offsets = [2, 0, 0], sizes = [1, 8, 128], strides = [1, 1, 1]} : vector<3x8x128xf32> to vector<1x8x128xf32>
    %76 = vector.shape_cast %75 : vector<1x8x128xf32> to vector<8x128xf32>
    %77 = arith.mulf %76, %74 : vector<8x128xf32>
    %78 = vector.extract_strided_slice %6 {offsets = [2, 0, 0], sizes = [1, 8, 128], strides = [1, 1, 1]} : vector<3x8x128xf32> to vector<1x8x128xf32>
    %79 = vector.shape_cast %78 : vector<1x8x128xf32> to vector<8x128xf32>
    %80 = arith.mulf %61, %61 : vector<8x128xf32>
    %81 = arith.mulf %80, %56 : vector<8x128xf32>
    %c0_14 = arith.constant 0 : index
    %c0_15 = arith.constant 0 : index
    %c0_16 = arith.constant 0 : index
    %c0_17 = arith.constant 0 : index
    %82 = vector.load %arg5[%c0_14, %c0_15, %c0_16, %c0_17] : memref<1x3x8x128xf32, #tpu.memory_space<vmem>>, vector<1x3x8x128xf32>
    %83 = vector.shape_cast %82 : vector<1x3x8x128xf32> to vector<3x8x128xf32>
    %c0_18 = arith.constant 0 : index
    %c0_19 = arith.constant 0 : index
    %c0_20 = arith.constant 0 : index
    %c0_21 = arith.constant 0 : index
    %84 = vector.load %arg6[%c0_18, %c0_19, %c0_20, %c0_21] : memref<1x3x8x128xf32, #tpu.memory_space<vmem>>, vector<1x3x8x128xf32>
    %85 = vector.shape_cast %84 : vector<1x3x8x128xf32> to vector<3x8x128xf32>
    %86 = arith.subf %83, %85 : vector<3x8x128xf32>
    %87 = math.absf %86 : vector<3x8x128xf32>
    %88 = vector.extract_strided_slice %87 {offsets = [0, 0, 0], sizes = [1, 8, 128], strides = [1, 1, 1]} : vector<3x8x128xf32> to vector<1x8x128xf32>
    %89 = vector.shape_cast %88 : vector<1x8x128xf32> to vector<8x128xf32>
    %90 = vector.extract_strided_slice %87 {offsets = [1, 0, 0], sizes = [1, 8, 128], strides = [1, 1, 1]} : vector<3x8x128xf32> to vector<1x8x128xf32>
    %91 = vector.shape_cast %90 : vector<1x8x128xf32> to vector<8x128xf32>
    %92 = arith.addf %89, %91 : vector<8x128xf32>
    %93 = vector.extract_strided_slice %87 {offsets = [2, 0, 0], sizes = [1, 8, 128], strides = [1, 1, 1]} : vector<3x8x128xf32> to vector<1x8x128xf32>
    %94 = vector.shape_cast %93 : vector<1x8x128xf32> to vector<8x128xf32>
    %95 = arith.addf %92, %94 : vector<8x128xf32>
    %c0_22 = arith.constant 0 : index
    %c0_23 = arith.constant 0 : index
    %c0_24 = arith.constant 0 : index
    %c0_25 = arith.constant 0 : index
    %96 = vector.load %arg7[%c0_22, %c0_23, %c0_24, %c0_25] : memref<1x1x8x128xf32, #tpu.memory_space<vmem>>, vector<1x1x8x128xf32>
    %97 = vector.shape_cast %96 : vector<1x1x8x128xf32> to vector<1x8x128xf32>
    %c0_26 = arith.constant 0 : index
    %c0_27 = arith.constant 0 : index
    %c0_28 = arith.constant 0 : index
    %c0_29 = arith.constant 0 : index
    %98 = vector.load %arg8[%c0_26, %c0_27, %c0_28, %c0_29] : memref<1x1x8x128xf32, #tpu.memory_space<vmem>>, vector<1x1x8x128xf32>
    %99 = vector.shape_cast %98 : vector<1x1x8x128xf32> to vector<1x8x128xf32>
    %100 = math.absf %97 : vector<1x8x128xf32>
    %cst_30 = arith.constant 0.000000e+00 : f32
    %101 = vector.broadcast %cst_30 : f32 to vector<1x8x128xf32>
    %102 = arith.subf %101, %100 : vector<1x8x128xf32>
    %103 = math.exp %102 : vector<1x8x128xf32>
    %cst_31 = arith.constant 1.000000e+00 : f32
    %104 = vector.broadcast %cst_31 : f32 to vector<1x8x128xf32>
    %105 = arith.addf %104, %103 : vector<1x8x128xf32>
    %106 = math.log %105 : vector<1x8x128xf32>
    %cst_32 = arith.constant 0.000000e+00 : f32
    %107 = vector.broadcast %cst_32 : f32 to vector<1x8x128xf32>
    %108 = arith.maximumf %97, %107 : vector<1x8x128xf32>
    %109 = arith.addf %108, %106 : vector<1x8x128xf32>
    %cst_33 = arith.constant 0.000000e+00 : f32
    %110 = vector.broadcast %cst_33 : f32 to vector<1x8x128xf32>
    %111 = arith.subf %110, %97 : vector<1x8x128xf32>
    %cst_34 = arith.constant 0.000000e+00 : f32
    %112 = vector.broadcast %cst_34 : f32 to vector<1x8x128xf32>
    %113 = arith.maximumf %111, %112 : vector<1x8x128xf32>
    %114 = arith.addf %113, %106 : vector<1x8x128xf32>
    %cst_35 = arith.constant 1.000000e+00 : f32
    %115 = vector.broadcast %cst_35 : f32 to vector<1x8x128xf32>
    %116 = arith.addf %115, %103 : vector<1x8x128xf32>
    %117 = tpu.reciprocal %116 {approx = true} : vector<1x8x128xf32> -> vector<1x8x128xf32>
    %118 = arith.mulf %116, %117 : vector<1x8x128xf32>
    %cst_36 = arith.constant 2.000000e+00 : f32
    %119 = vector.broadcast %cst_36 : f32 to vector<1x8x128xf32>
    %120 = arith.subf %119, %118 : vector<1x8x128xf32>
    %121 = arith.mulf %117, %120 : vector<1x8x128xf32>
    %cst_37 = arith.constant 0.000000e+00 : f32
    %122 = vector.broadcast %cst_37 : f32 to vector<1x8x128xf32>
    %123 = arith.cmpf oge, %97, %122 : vector<1x8x128xf32>
    %124 = arith.mulf %103, %121 : vector<1x8x128xf32>
    %125 = arith.select %123, %121, %124 : vector<1x8x128xi1>, vector<1x8x128xf32>
    %cst_38 = arith.constant 1.000000e+02 : f32
    %126 = vector.broadcast %cst_38 : f32 to vector<1x8x128xf32>
    %127 = arith.minimumf %114, %126 : vector<1x8x128xf32>
    %128 = arith.mulf %99, %127 : vector<1x8x128xf32>
    %cst_39 = arith.constant 1.000000e+00 : f32
    %129 = vector.broadcast %cst_39 : f32 to vector<1x8x128xf32>
    %130 = arith.subf %129, %99 : vector<1x8x128xf32>
    %cst_40 = arith.constant 1.000000e+02 : f32
    %131 = vector.broadcast %cst_40 : f32 to vector<1x8x128xf32>
    %132 = arith.minimumf %109, %131 : vector<1x8x128xf32>
    %133 = arith.mulf %130, %132 : vector<1x8x128xf32>
    %134 = arith.addf %128, %133 : vector<1x8x128xf32>
    %cst_41 = arith.constant 0.000000e+00 : f32
    %135 = vector.broadcast %cst_41 : f32 to vector<1x8x128xf32>
    %136 = arith.subf %135, %134 : vector<1x8x128xf32>
    %137 = math.exp %136 : vector<1x8x128xf32>
    %cst_42 = arith.constant 1.000000e+00 : f32
    %138 = vector.broadcast %cst_42 : f32 to vector<1x8x128xf32>
    %139 = arith.subf %138, %137 : vector<1x8x128xf32>
    %140 = arith.mulf %139, %139 : vector<1x8x128xf32>
    %141 = arith.mulf %140, %134 : vector<1x8x128xf32>
    %cst_43 = arith.constant 2.500000e-01 : f32
    %142 = vector.broadcast %cst_43 : f32 to vector<1x8x128xf32>
    %143 = arith.mulf %142, %99 : vector<1x8x128xf32>
    %cst_44 = arith.constant 1.000000e+00 : f32
    %144 = vector.broadcast %cst_44 : f32 to vector<1x8x128xf32>
    %145 = arith.subf %144, %99 : vector<1x8x128xf32>
    %cst_45 = arith.constant 7.500000e-01 : f32
    %146 = vector.broadcast %cst_45 : f32 to vector<1x8x128xf32>
    %147 = arith.mulf %146, %145 : vector<1x8x128xf32>
    %148 = arith.addf %143, %147 : vector<1x8x128xf32>
    %149 = arith.mulf %141, %148 : vector<1x8x128xf32>
    %150 = vector.shape_cast %149 : vector<1x8x128xf32> to vector<8x128xf32>
    %151 = vector.shape_cast %99 : vector<1x8x128xf32> to vector<8x128xf32>
    %152 = vector.shape_cast %125 : vector<1x8x128xf32> to vector<8x128xf32>
    %153 = arith.mulf %151, %152 : vector<8x128xf32>
    %154 = vector.shape_cast %125 : vector<1x8x128xf32> to vector<8x128xf32>
    %155 = vector.shape_cast %99 : vector<1x8x128xf32> to vector<8x128xf32>
    %c0_46 = arith.constant 0 : index
    %c0_47 = arith.constant 0 : index
    %c0_48 = arith.constant 0 : index
    %156 = vector.load %arg9[%c0_46, %c0_47, %c0_48] : memref<1x8x128xf32, #tpu.memory_space<vmem>>, vector<1x8x128xf32>
    %157 = vector.shape_cast %156 : vector<1x8x128xf32> to vector<8x128xf32>
    %158 = arith.addf %157, %81 : vector<8x128xf32>
    %c0_49 = arith.constant 0 : index
    %c0_50 = arith.constant 0 : index
    %c0_51 = arith.constant 0 : index
    %159 = vector.load %arg9[%c0_49, %c0_50, %c0_51] : memref<1x8x128xf32, #tpu.memory_space<vmem>>, vector<1x8x128xf32>
    %160 = vector.shape_cast %159 : vector<1x8x128xf32> to vector<8x128xf32>
    %161 = vector.shape_cast %158 : vector<8x128xf32> to vector<1x8x128xf32>
    tpu.vector_store %arg9[%c0_49, %c0_50, %c0_51], %161 {strides = array<i32>} : memref<1x8x128xf32, #tpu.memory_space<vmem>>, vector<1x8x128xf32>,
    %c0_52 = arith.constant 0 : index
    %c0_53 = arith.constant 0 : index
    %c0_54 = arith.constant 0 : index
    %c0_55 = arith.constant 0 : index
    %162 = vector.load %arg10[%c0_52, %c0_53, %c0_54, %c0_55] : memref<1x3x8x128xf32, #tpu.memory_space<vmem>>, vector<1x1x8x128xf32>
    %163 = vector.shape_cast %162 : vector<1x1x8x128xf32> to vector<8x128xf32>
    %164 = arith.addf %163, %65 : vector<8x128xf32>
    %c0_56 = arith.constant 0 : index
    %c0_57 = arith.constant 0 : index
    %c0_58 = arith.constant 0 : index
    %c0_59 = arith.constant 0 : index
    %165 = vector.load %arg10[%c0_56, %c0_57, %c0_58, %c0_59] : memref<1x3x8x128xf32, #tpu.memory_space<vmem>>, vector<1x1x8x128xf32>
    %166 = vector.shape_cast %165 : vector<1x1x8x128xf32> to vector<8x128xf32>
    %167 = vector.shape_cast %164 : vector<8x128xf32> to vector<1x1x8x128xf32>
    tpu.vector_store %arg10[%c0_56, %c0_57, %c0_58, %c0_59], %167 {strides = array<i32>} : memref<1x3x8x128xf32, #tpu.memory_space<vmem>>, vector<1x1x8x128xf32>,
    %c0_60 = arith.constant 0 : index
    %c1 = arith.constant 1 : index
    %c0_61 = arith.constant 0 : index
    %c0_62 = arith.constant 0 : index
    %168 = vector.load %arg10[%c0_60, %c1, %c0_61, %c0_62] : memref<1x3x8x128xf32, #tpu.memory_space<vmem>>, vector<1x1x8x128xf32>
    %169 = vector.shape_cast %168 : vector<1x1x8x128xf32> to vector<8x128xf32>
    %170 = arith.addf %169, %71 : vector<8x128xf32>
    %c0_63 = arith.constant 0 : index
    %c1_64 = arith.constant 1 : index
    %c0_65 = arith.constant 0 : index
    %c0_66 = arith.constant 0 : index
    %171 = vector.load %arg10[%c0_63, %c1_64, %c0_65, %c0_66] : memref<1x3x8x128xf32, #tpu.memory_space<vmem>>, vector<1x1x8x128xf32>
    %172 = vector.shape_cast %171 : vector<1x1x8x128xf32> to vector<8x128xf32>
    %173 = vector.shape_cast %170 : vector<8x128xf32> to vector<1x1x8x128xf32>
    tpu.vector_store %arg10[%c0_63, %c1_64, %c0_65, %c0_66], %173 {strides = array<i32>} : memref<1x3x8x128xf32, #tpu.memory_space<vmem>>, vector<1x1x8x128xf32>,
    %c0_67 = arith.constant 0 : index
    %c2 = arith.constant 2 : index
    %c0_68 = arith.constant 0 : index
    %c0_69 = arith.constant 0 : index
    %174 = vector.load %arg10[%c0_67, %c2, %c0_68, %c0_69] : memref<1x3x8x128xf32, #tpu.memory_space<vmem>>, vector<1x1x8x128xf32>
    %175 = vector.shape_cast %174 : vector<1x1x8x128xf32> to vector<8x128xf32>
    %176 = arith.addf %175, %77 : vector<8x128xf32>
    %c0_70 = arith.constant 0 : index
    %c2_71 = arith.constant 2 : index
    %c0_72 = arith.constant 0 : index
    %c0_73 = arith.constant 0 : index
    %177 = vector.load %arg10[%c0_70, %c2_71, %c0_72, %c0_73] : memref<1x3x8x128xf32, #tpu.memory_space<vmem>>, vector<1x1x8x128xf32>
    %178 = vector.shape_cast %177 : vector<1x1x8x128xf32> to vector<8x128xf32>
    %179 = vector.shape_cast %176 : vector<8x128xf32> to vector<1x1x8x128xf32>
    tpu.vector_store %arg10[%c0_70, %c2_71, %c0_72, %c0_73], %179 {strides = array<i32>} : memref<1x3x8x128xf32, #tpu.memory_space<vmem>>, vector<1x1x8x128xf32>,
    %c0_74 = arith.constant 0 : index
    %c0_75 = arith.constant 0 : index
    %c0_76 = arith.constant 0 : index
    %c0_77 = arith.constant 0 : index
    %180 = vector.load %arg11[%c0_74, %c0_75, %c0_76, %c0_77] : memref<1x3x8x128xf32, #tpu.memory_space<vmem>>, vector<1x1x8x128xf32>
    %181 = vector.shape_cast %180 : vector<1x1x8x128xf32> to vector<8x128xf32>
    %182 = arith.addf %181, %62 : vector<8x128xf32>
    %c0_78 = arith.constant 0 : index
    %c0_79 = arith.constant 0 : index
    %c0_80 = arith.constant 0 : index
    %c0_81 = arith.constant 0 : index
    %183 = vector.load %arg11[%c0_78, %c0_79, %c0_80, %c0_81] : memref<1x3x8x128xf32, #tpu.memory_space<vmem>>, vector<1x1x8x128xf32>
    %184 = vector.shape_cast %183 : vector<1x1x8x128xf32> to vector<8x128xf32>
    %185 = vector.shape_cast %182 : vector<8x128xf32> to vector<1x1x8x128xf32>
    tpu.vector_store %arg11[%c0_78, %c0_79, %c0_80, %c0_81], %185 {strides = array<i32>} : memref<1x3x8x128xf32, #tpu.memory_space<vmem>>, vector<1x1x8x128xf32>,
    %c0_82 = arith.constant 0 : index
    %c1_83 = arith.constant 1 : index
    %c0_84 = arith.constant 0 : index
    %c0_85 = arith.constant 0 : index
    %186 = vector.load %arg11[%c0_82, %c1_83, %c0_84, %c0_85] : memref<1x3x8x128xf32, #tpu.memory_space<vmem>>, vector<1x1x8x128xf32>
    %187 = vector.shape_cast %186 : vector<1x1x8x128xf32> to vector<8x128xf32>
    %188 = arith.addf %187, %68 : vector<8x128xf32>
    %c0_86 = arith.constant 0 : index
    %c1_87 = arith.constant 1 : index
    %c0_88 = arith.constant 0 : index
    %c0_89 = arith.constant 0 : index
    %189 = vector.load %arg11[%c0_86, %c1_87, %c0_88, %c0_89] : memref<1x3x8x128xf32, #tpu.memory_space<vmem>>, vector<1x1x8x128xf32>
    %190 = vector.shape_cast %189 : vector<1x1x8x128xf32> to vector<8x128xf32>
    %191 = vector.shape_cast %188 : vector<8x128xf32> to vector<1x1x8x128xf32>
    tpu.vector_store %arg11[%c0_86, %c1_87, %c0_88, %c0_89], %191 {strides = array<i32>} : memref<1x3x8x128xf32, #tpu.memory_space<vmem>>, vector<1x1x8x128xf32>,
    %c0_90 = arith.constant 0 : index
    %c2_91 = arith.constant 2 : index
    %c0_92 = arith.constant 0 : index
    %c0_93 = arith.constant 0 : index
    %192 = vector.load %arg11[%c0_90, %c2_91, %c0_92, %c0_93] : memref<1x3x8x128xf32, #tpu.memory_space<vmem>>, vector<1x1x8x128xf32>
    %193 = vector.shape_cast %192 : vector<1x1x8x128xf32> to vector<8x128xf32>
    %194 = arith.addf %193, %74 : vector<8x128xf32>
    %c0_94 = arith.constant 0 : index
    %c2_95 = arith.constant 2 : index
    %c0_96 = arith.constant 0 : index
    %c0_97 = arith.constant 0 : index
    %195 = vector.load %arg11[%c0_94, %c2_95, %c0_96, %c0_97] : memref<1x3x8x128xf32, #tpu.memory_space<vmem>>, vector<1x1x8x128xf32>
    %196 = vector.shape_cast %195 : vector<1x1x8x128xf32> to vector<8x128xf32>
    %197 = vector.shape_cast %194 : vector<8x128xf32> to vector<1x1x8x128xf32>
    tpu.vector_store %arg11[%c0_94, %c2_95, %c0_96, %c0_97], %197 {strides = array<i32>} : memref<1x3x8x128xf32, #tpu.memory_space<vmem>>, vector<1x1x8x128xf32>,
    %c0_98 = arith.constant 0 : index
    %c0_99 = arith.constant 0 : index
    %c0_100 = arith.constant 0 : index
    %c0_101 = arith.constant 0 : index
    %198 = vector.load %arg12[%c0_98, %c0_99, %c0_100, %c0_101] : memref<1x3x8x128xf32, #tpu.memory_space<vmem>>, vector<1x1x8x128xf32>
    %199 = vector.shape_cast %198 : vector<1x1x8x128xf32> to vector<8x128xf32>
    %200 = arith.addf %199, %67 : vector<8x128xf32>
    %c0_102 = arith.constant 0 : index
    %c0_103 = arith.constant 0 : index
    %c0_104 = arith.constant 0 : index
    %c0_105 = arith.constant 0 : index
    %201 = vector.load %arg12[%c0_102, %c0_103, %c0_104, %c0_105] : memref<1x3x8x128xf32, #tpu.memory_space<vmem>>, vector<1x1x8x128xf32>
    %202 = vector.shape_cast %201 : vector<1x1x8x128xf32> to vector<8x128xf32>
    %203 = vector.shape_cast %200 : vector<8x128xf32> to vector<1x1x8x128xf32>
    tpu.vector_store %arg12[%c0_102, %c0_103, %c0_104, %c0_105], %203 {strides = array<i32>} : memref<1x3x8x128xf32, #tpu.memory_space<vmem>>, vector<1x1x8x128xf32>,
    %c0_106 = arith.constant 0 : index
    %c1_107 = arith.constant 1 : index
    %c0_108 = arith.constant 0 : index
    %c0_109 = arith.constant 0 : index
    %204 = vector.load %arg12[%c0_106, %c1_107, %c0_108, %c0_109] : memref<1x3x8x128xf32, #tpu.memory_space<vmem>>, vector<1x1x8x128xf32>
    %205 = vector.shape_cast %204 : vector<1x1x8x128xf32> to vector<8x128xf32>
    %206 = arith.addf %205, %73 : vector<8x128xf32>
    %c0_110 = arith.constant 0 : index
    %c1_111 = arith.constant 1 : index
    %c0_112 = arith.constant 0 : index
    %c0_113 = arith.constant 0 : index
    %207 = vector.load %arg12[%c0_110, %c1_111, %c0_112, %c0_113] : memref<1x3x8x128xf32, #tpu.memory_space<vmem>>, vector<1x1x8x128xf32>
    %208 = vector.shape_cast %207 : vector<1x1x8x128xf32> to vector<8x128xf32>
    %209 = vector.shape_cast %206 : vector<8x128xf32> to vector<1x1x8x128xf32>
    tpu.vector_store %arg12[%c0_110, %c1_111, %c0_112, %c0_113], %209 {strides = array<i32>} : memref<1x3x8x128xf32, #tpu.memory_space<vmem>>, vector<1x1x8x128xf32>,
    %c0_114 = arith.constant 0 : index
    %c2_115 = arith.constant 2 : index
    %c0_116 = arith.constant 0 : index
    %c0_117 = arith.constant 0 : index
    %210 = vector.load %arg12[%c0_114, %c2_115, %c0_116, %c0_117] : memref<1x3x8x128xf32, #tpu.memory_space<vmem>>, vector<1x1x8x128xf32>
    %211 = vector.shape_cast %210 : vector<1x1x8x128xf32> to vector<8x128xf32>
    %212 = arith.addf %211, %79 : vector<8x128xf32>
    %c0_118 = arith.constant 0 : index
    %c2_119 = arith.constant 2 : index
    %c0_120 = arith.constant 0 : index
    %c0_121 = arith.constant 0 : index
    %213 = vector.load %arg12[%c0_118, %c2_119, %c0_120, %c0_121] : memref<1x3x8x128xf32, #tpu.memory_space<vmem>>, vector<1x1x8x128xf32>
    %214 = vector.shape_cast %213 : vector<1x1x8x128xf32> to vector<8x128xf32>
    %215 = vector.shape_cast %212 : vector<8x128xf32> to vector<1x1x8x128xf32>
    tpu.vector_store %arg12[%c0_118, %c2_119, %c0_120, %c0_121], %215 {strides = array<i32>} : memref<1x3x8x128xf32, #tpu.memory_space<vmem>>, vector<1x1x8x128xf32>,
    %c0_122 = arith.constant 0 : index
    %c0_123 = arith.constant 0 : index
    %c0_124 = arith.constant 0 : index
    %216 = vector.load %arg13[%c0_122, %c0_123, %c0_124] : memref<1x8x128xf32, #tpu.memory_space<vmem>>, vector<1x8x128xf32>
    %217 = vector.shape_cast %216 : vector<1x8x128xf32> to vector<8x128xf32>
    %218 = arith.addf %217, %95 : vector<8x128xf32>
    %c0_125 = arith.constant 0 : index
    %c0_126 = arith.constant 0 : index
    %c0_127 = arith.constant 0 : index
    %219 = vector.load %arg13[%c0_125, %c0_126, %c0_127] : memref<1x8x128xf32, #tpu.memory_space<vmem>>, vector<1x8x128xf32>
    %220 = vector.shape_cast %219 : vector<1x8x128xf32> to vector<8x128xf32>
    %221 = vector.shape_cast %218 : vector<8x128xf32> to vector<1x8x128xf32>
    tpu.vector_store %arg13[%c0_125, %c0_126, %c0_127], %221 {strides = array<i32>} : memref<1x8x128xf32, #tpu.memory_space<vmem>>, vector<1x8x128xf32>,
    %c0_128 = arith.constant 0 : index
    %c0_129 = arith.constant 0 : index
    %c0_130 = arith.constant 0 : index
    %222 = vector.load %arg14[%c0_128, %c0_129, %c0_130] : memref<1x8x128xf32, #tpu.memory_space<vmem>>, vector<1x8x128xf32>
    %223 = vector.shape_cast %222 : vector<1x8x128xf32> to vector<8x128xf32>
    %224 = arith.addf %223, %150 : vector<8x128xf32>
    %c0_131 = arith.constant 0 : index
    %c0_132 = arith.constant 0 : index
    %c0_133 = arith.constant 0 : index
    %225 = vector.load %arg14[%c0_131, %c0_132, %c0_133] : memref<1x8x128xf32, #tpu.memory_space<vmem>>, vector<1x8x128xf32>
    %226 = vector.shape_cast %225 : vector<1x8x128xf32> to vector<8x128xf32>
    %227 = vector.shape_cast %224 : vector<8x128xf32> to vector<1x8x128xf32>
    tpu.vector_store %arg14[%c0_131, %c0_132, %c0_133], %227 {strides = array<i32>} : memref<1x8x128xf32, #tpu.memory_space<vmem>>, vector<1x8x128xf32>,
    %c0_134 = arith.constant 0 : index
    %c0_135 = arith.constant 0 : index
    %c0_136 = arith.constant 0 : index
    %c0_137 = arith.constant 0 : index
    %228 = vector.load %arg15[%c0_134, %c0_135, %c0_136, %c0_137] : memref<1x1x8x128xf32, #tpu.memory_space<vmem>>, vector<1x1x8x128xf32>
    %229 = vector.shape_cast %228 : vector<1x1x8x128xf32> to vector<8x128xf32>
    %230 = arith.addf %229, %153 : vector<8x128xf32>
    %c0_138 = arith.constant 0 : index
    %c0_139 = arith.constant 0 : index
    %c0_140 = arith.constant 0 : index
    %c0_141 = arith.constant 0 : index
    %231 = vector.load %arg15[%c0_138, %c0_139, %c0_140, %c0_141] : memref<1x1x8x128xf32, #tpu.memory_space<vmem>>, vector<1x1x8x128xf32>
    %232 = vector.shape_cast %231 : vector<1x1x8x128xf32> to vector<8x128xf32>
    %233 = vector.shape_cast %230 : vector<8x128xf32> to vector<1x1x8x128xf32>
    tpu.vector_store %arg15[%c0_138, %c0_139, %c0_140, %c0_141], %233 {strides = array<i32>} : memref<1x1x8x128xf32, #tpu.memory_space<vmem>>, vector<1x1x8x128xf32>,
    %c0_142 = arith.constant 0 : index
    %c0_143 = arith.constant 0 : index
    %c0_144 = arith.constant 0 : index
    %c0_145 = arith.constant 0 : index
    %234 = vector.load %arg16[%c0_142, %c0_143, %c0_144, %c0_145] : memref<1x1x8x128xf32, #tpu.memory_space<vmem>>, vector<1x1x8x128xf32>
    %235 = vector.shape_cast %234 : vector<1x1x8x128xf32> to vector<8x128xf32>
    %236 = arith.addf %235, %154 : vector<8x128xf32>
    %c0_146 = arith.constant 0 : index
    %c0_147 = arith.constant 0 : index
    %c0_148 = arith.constant 0 : index
    %c0_149 = arith.constant 0 : index
    %237 = vector.load %arg16[%c0_146, %c0_147, %c0_148, %c0_149] : memref<1x1x8x128xf32, #tpu.memory_space<vmem>>, vector<1x1x8x128xf32>
    %238 = vector.shape_cast %237 : vector<1x1x8x128xf32> to vector<8x128xf32>
    %239 = vector.shape_cast %236 : vector<8x128xf32> to vector<1x1x8x128xf32>
    tpu.vector_store %arg16[%c0_146, %c0_147, %c0_148, %c0_149], %239 {strides = array<i32>} : memref<1x1x8x128xf32, #tpu.memory_space<vmem>>, vector<1x1x8x128xf32>,
    %c0_150 = arith.constant 0 : index
    %c0_151 = arith.constant 0 : index
    %c0_152 = arith.constant 0 : index
    %c0_153 = arith.constant 0 : index
    %240 = vector.load %arg17[%c0_150, %c0_151, %c0_152, %c0_153] : memref<1x1x8x128xf32, #tpu.memory_space<vmem>>, vector<1x1x8x128xf32>
    %241 = vector.shape_cast %240 : vector<1x1x8x128xf32> to vector<8x128xf32>
    %242 = arith.addf %241, %155 : vector<8x128xf32>
    %c0_154 = arith.constant 0 : index
    %c0_155 = arith.constant 0 : index
    %c0_156 = arith.constant 0 : index
    %c0_157 = arith.constant 0 : index
    %243 = vector.load %arg17[%c0_154, %c0_155, %c0_156, %c0_157] : memref<1x1x8x128xf32, #tpu.memory_space<vmem>>, vector<1x1x8x128xf32>
    %244 = vector.shape_cast %243 : vector<1x1x8x128xf32> to vector<8x128xf32>
    %245 = vector.shape_cast %242 : vector<8x128xf32> to vector<1x1x8x128xf32>
    tpu.vector_store %arg17[%c0_154, %c0_155, %c0_156, %c0_157], %245 {strides = array<i32>} : memref<1x1x8x128xf32, #tpu.memory_space<vmem>>, vector<1x1x8x128xf32>,
    return
  }
  func.func @transform_0(%arg0: i32, %arg1: i32, %arg2: i32) -> (i32, i32, i32, i32) {
    %c1_i32 = arith.constant 1 : i32
    %0 = arith.muli %arg1, %c1_i32 : i32
    %1 = arith.addi %0, %arg2 : i32
    %c0_i32 = arith.constant 0 : i32
    %c0_i32_0 = arith.constant 0 : i32
    %c0_i32_1 = arith.constant 0 : i32
    return %arg0, %c0_i32, %1, %c0_i32_0 : i32, i32, i32, i32
  }
  func.func @transform_1(%arg0: i32, %arg1: i32, %arg2: i32) -> (i32, i32, i32, i32) {
    %c1_i32 = arith.constant 1 : i32
    %0 = arith.muli %arg1, %c1_i32 : i32
    %1 = arith.addi %0, %arg2 : i32
    %c0_i32 = arith.constant 0 : i32
    %c0_i32_0 = arith.constant 0 : i32
    %c0_i32_1 = arith.constant 0 : i32
    return %arg0, %c0_i32, %1, %c0_i32_0 : i32, i32, i32, i32
  }
  func.func @transform_2(%arg0: i32, %arg1: i32, %arg2: i32) -> (i32, i32, i32, i32) {
    %c1_i32 = arith.constant 1 : i32
    %0 = arith.muli %arg1, %c1_i32 : i32
    %1 = arith.addi %0, %arg2 : i32
    %c0_i32 = arith.constant 0 : i32
    %c0_i32_0 = arith.constant 0 : i32
    %c0_i32_1 = arith.constant 0 : i32
    return %arg0, %c0_i32, %1, %c0_i32_0 : i32, i32, i32, i32
  }
  func.func @transform_3(%arg0: i32, %arg1: i32, %arg2: i32) -> (i32, i32, i32, i32) {
    %c1_i32 = arith.constant 1 : i32
    %0 = arith.muli %arg1, %c1_i32 : i32
    %1 = arith.addi %0, %arg2 : i32
    %c0_i32 = arith.constant 0 : i32
    %c0_i32_0 = arith.constant 0 : i32
    %c0_i32_1 = arith.constant 0 : i32
    return %arg0, %c0_i32, %1, %c0_i32_0 : i32, i32, i32, i32
  }
  func.func @transform_4(%arg0: i32, %arg1: i32, %arg2: i32) -> (i32, i32, i32, i32) {
    %c1_i32 = arith.constant 1 : i32
    %0 = arith.muli %arg1, %c1_i32 : i32
    %1 = arith.addi %0, %arg2 : i32
    %c0_i32 = arith.constant 0 : i32
    %c0_i32_0 = arith.constant 0 : i32
    %c0_i32_1 = arith.constant 0 : i32
    return %arg0, %c0_i32, %1, %c0_i32_0 : i32, i32, i32, i32
  }
  func.func @transform_5(%arg0: i32, %arg1: i32, %arg2: i32) -> (i32, i32, i32, i32) {
    %c1_i32 = arith.constant 1 : i32
    %0 = arith.muli %arg1, %c1_i32 : i32
    %1 = arith.addi %0, %arg2 : i32
    %c0_i32 = arith.constant 0 : i32
    %c0_i32_0 = arith.constant 0 : i32
    %c0_i32_1 = arith.constant 0 : i32
    return %arg0, %c0_i32, %1, %c0_i32_0 : i32, i32, i32, i32
  }
  func.func @transform_6(%arg0: i32, %arg1: i32, %arg2: i32) -> (i32, i32, i32) {
    %c1_i32 = arith.constant 1 : i32
    %0 = arith.muli %arg0, %c1_i32 : i32
    %1 = arith.addi %0, %arg1 : i32
    %c0_i32 = arith.constant 0 : i32
    %c0_i32_0 = arith.constant 0 : i32
    %c0_i32_1 = arith.constant 0 : i32
    return %1, %c0_i32, %c0_i32_0 : i32, i32, i32
  }
  func.func @transform_7(%arg0: i32, %arg1: i32, %arg2: i32) -> (i32, i32, i32, i32) {
    %c1_i32 = arith.constant 1 : i32
    %0 = arith.muli %arg0, %c1_i32 : i32
    %1 = arith.addi %0, %arg1 : i32
    %c0_i32 = arith.constant 0 : i32
    %c0_i32_0 = arith.constant 0 : i32
    %c0_i32_1 = arith.constant 0 : i32
    %c0_i32_2 = arith.constant 0 : i32
    return %1, %c0_i32, %c0_i32_0, %c0_i32_1 : i32, i32, i32, i32
  }
  func.func @transform_8(%arg0: i32, %arg1: i32, %arg2: i32) -> (i32, i32, i32, i32) {
    %c1_i32 = arith.constant 1 : i32
    %0 = arith.muli %arg0, %c1_i32 : i32
    %1 = arith.addi %0, %arg1 : i32
    %c0_i32 = arith.constant 0 : i32
    %c0_i32_0 = arith.constant 0 : i32
    %c0_i32_1 = arith.constant 0 : i32
    %c0_i32_2 = arith.constant 0 : i32
    return %1, %c0_i32, %c0_i32_0, %c0_i32_1 : i32, i32, i32, i32
  }
  func.func @transform_9(%arg0: i32, %arg1: i32, %arg2: i32) -> (i32, i32, i32, i32) {
    %c1_i32 = arith.constant 1 : i32
    %0 = arith.muli %arg0, %c1_i32 : i32
    %1 = arith.addi %0, %arg1 : i32
    %c0_i32 = arith.constant 0 : i32
    %c0_i32_0 = arith.constant 0 : i32
    %c0_i32_1 = arith.constant 0 : i32
    %c0_i32_2 = arith.constant 0 : i32
    return %1, %c0_i32, %c0_i32_0, %c0_i32_1 : i32, i32, i32, i32
  }
  func.func @transform_10(%arg0: i32, %arg1: i32, %arg2: i32) -> (i32, i32, i32) {
    %c1_i32 = arith.constant 1 : i32
    %0 = arith.muli %arg0, %c1_i32 : i32
    %1 = arith.addi %0, %arg1 : i32
    %c0_i32 = arith.constant 0 : i32
    %c0_i32_0 = arith.constant 0 : i32
    %c0_i32_1 = arith.constant 0 : i32
    return %1, %c0_i32, %c0_i32_0 : i32, i32, i32
  }
  func.func @transform_11(%arg0: i32, %arg1: i32, %arg2: i32) -> (i32, i32, i32) {
    %c1_i32 = arith.constant 1 : i32
    %0 = arith.muli %arg0, %c1_i32 : i32
    %1 = arith.addi %0, %arg1 : i32
    %c0_i32 = arith.constant 0 : i32
    %c0_i32_0 = arith.constant 0 : i32
    %c0_i32_1 = arith.constant 0 : i32
    return %1, %c0_i32, %c0_i32_0 : i32, i32, i32
  }
  func.func @transform_12(%arg0: i32, %arg1: i32, %arg2: i32) -> (i32, i32, i32, i32) {
    %c1_i32 = arith.constant 1 : i32
    %0 = arith.muli %arg0, %c1_i32 : i32
    %1 = arith.addi %0, %arg1 : i32
    %c0_i32 = arith.constant 0 : i32
    %c0_i32_0 = arith.constant 0 : i32
    %c0_i32_1 = arith.constant 0 : i32
    %c0_i32_2 = arith.constant 0 : i32
    return %1, %c0_i32, %c0_i32_0, %c0_i32_1 : i32, i32, i32, i32
  }
  func.func @transform_13(%arg0: i32, %arg1: i32, %arg2: i32) -> (i32, i32, i32, i32) {
    %c1_i32 = arith.constant 1 : i32
    %0 = arith.muli %arg0, %c1_i32 : i32
    %1 = arith.addi %0, %arg1 : i32
    %c0_i32 = arith.constant 0 : i32
    %c0_i32_0 = arith.constant 0 : i32
    %c0_i32_1 = arith.constant 0 : i32
    %c0_i32_2 = arith.constant 0 : i32
    return %1, %c0_i32, %c0_i32_0, %c0_i32_1 : i32, i32, i32, i32
  }
  func.func @transform_14(%arg0: i32, %arg1: i32, %arg2: i32) -> (i32, i32, i32, i32) {
    %c1_i32 = arith.constant 1 : i32
    %0 = arith.muli %arg0, %c1_i32 : i32
    %1 = arith.addi %0, %arg1 : i32
    %c0_i32 = arith.constant 0 : i32
    %c0_i32_0 = arith.constant 0 : i32
    %c0_i32_1 = arith.constant 0 : i32
    %c0_i32_2 = arith.constant 0 : i32
    return %1, %c0_i32, %c0_i32_0, %c0_i32_1 : i32, i32, i32, i32
  }
}

</mosaic_0001>

<bundles_post_ra>
// kernel: cell_det_seg_rec_poi_loss.1
= control target key start
LH: loop header
LB: loop body
LE: loop exit
PB: predicated region body
PF: predicated region fallthrough
CT: control target
= control target key end

     0   :  { %s1605_s29 = smov 0   ;;  %s1607_s30 = smov 0   ;;  %s1726_s0 = inlined_call_operand.vmem [shape: f32[2,3,8,128], index: 0, kind: input, shape index: {}]   ;;  %s1727_s1 = inlined_call_operand.vmem [shape: f32[2,3,8,128], index: 1, kind: input, shape index: {}]   ;;  %s1728_s2 = inlined_call_operand.vmem [shape: f32[2,3,8,128], index: 2, kind: input, shape index: {}]   ;;  %s1729_s3 = inlined_call_operand.vmem [shape: f32[2,3,8,128], index: 3, kind: input, shape index: {}]   ;;  %s1730_s4 = inlined_call_operand.vmem [shape: f32[2,1,8,128], index: 4, kind: input, shape index: {}]   ;;  %s1731_s5 = inlined_call_operand.vmem [shape: f32[2,1,8,128], index: 5, kind: input, shape index: {}]   ;;  %s1732_s6 = inlined_call_operand.vmem [shape: f32[2,8,128], index: 6, kind: output, shape index: {0}]   ;;  %s1733_s7 = inlined_call_operand.vmem [shape: f32[2,3,8,128], index: 7, kind: output, shape index: {1}]   ;;  %s1734_s8 = inlined_call_operand.vmem [shape: f32[2,3,8,128], index: 8, kind: output, shape index: {2}]   ;;  %s1735_s9 = inlined_call_operand.vmem [shape: f32[2,3,8,128], index: 9, kind: output, shape index: {3}]   ;;  %s1736_s10 = inlined_call_operand.vmem [shape: f32[2,8,128], index: 10, kind: output, shape index: {4}]   ;;  %s1737_s11 = inlined_call_operand.vmem [shape: f32[2,8,128], index: 11, kind: output, shape index: {5}]   ;;  %s1738_s12 = inlined_call_operand.vmem [shape: f32[2,1,8,128], index: 12, kind: output, shape index: {6}]   ;;  %s1739_s13 = inlined_call_operand.vmem [shape: f32[2,1,8,128], index: 13, kind: output, shape index: {7}]   ;;  %s1740_s14 = inlined_call_operand.vmem [shape: f32[2,1,8,128], index: 14, kind: output, shape index: {8}]  }
   0x1   :  { %s1609_s15 = smov 0  }
   0x2 LB: > { %s44_s16 = sadd.s32 1, %s1524_s30  ;;  %p1430_p0 = scmp.ge.s32.totalorder %s1528_s15, 1  ;;  %s1528_s15 = sphi %s1609_s15, %s25_s15   ;;  %s1524_s30 = sphi %s1607_s30, %s1744_s30   ;;  %s1520_s29 = sphi %s1605_s29, %s1743_s29  }
   0x3   : > { %p46_p1 = scmp.ge.s32.totalorder %s44_s16, 2  ;;  %p568_p2 = scmp.lt.s32.totalorder %s1528_s15, 3 }
   0x5   : > { %s1746_s16 = smov (%p46_p1, %s44_s16), 0  ;;  %p569_p3 = pnand %p1430_p0, %p568_p2 }
   0x6   : > { %1741 = sst [smem:[#allocation2_spill]] %s1746_s16  ;;  %p705_p4 = scmp.lt.s32.totalorder (!%p569_p3), %s1520_s29, 1 }
   0x7   : > { %572 = sbr.rel (%p569_p3) target bundleno = 93 (0x5d), region = 44 }
   0xe   : > { %s1748_s29 = smov (!%p705_p4, %s1520_s29), 1 }
   0xf   : > { %s1623_s17 = smul.u32 24, %s1748_s29  ;;  %s1625_s18 = sshll.u32 %s1748_s29, 3 }
  0x10   : > { %s751_s26 = scalar_lea.vmem %s1730_s4, %s1625_s18  ;;  %s760_s29 = scalar_lea.vmem %s1731_s5, %s1625_s18 }
  0x11   : > { %s787_s21 = scalar_lea.vmem %s1735_s9, %s1623_s17  ;;  %s712_s24 = scalar_lea.vmem %s1726_s0, %s1623_s17  ;;  %v1664_v17 = vld [vmem:[%s751_s26] sm:$0xff] }
  0x12   : > { %s722_s27 = scalar_lea.vmem %s1727_s1, %s1623_s17  ;;  %v838_v0 = vld [vmem:[%s712_s24] sm:$0xff]  ;;  %v839_v1 = vld [vmem:[%s712_s24 + $0x8] sm:$0xff]  ;;  %v840_v2 = vld [vmem:[%s712_s24 + $0x10] sm:$0xff]  ;;  %s732_s16 = scalar_lea.vmem %s1728_s2, %s1623_s17  ;;  %v903_v22 = vand.u32 2147483647, %v1664_v17  ;;  %v912_v40 = vsub.f32 0.0, %v1664_v17 }
  0x13   : > { %v1643_v3 = vld [vmem:[%s722_s27] sm:$0xff]  ;;  %v1645_v4 = vld [vmem:[%s722_s27 + $0x8] sm:$0xff]  ;;  %v1647_v5 = vld [vmem:[%s722_s27 + $0x10] sm:$0xff]  ;;  %v844_v6 = vmax.f32 %v838_v0, %v839_v1  ;;  %s742_s22 = scalar_lea.vmem %s1729_s3, %s1623_s17  ;;  %s817_s19 = scalar_lea.vmem %s1740_s14, %s1625_s18  ;;  %v910_v44 = vmax.f32 %v1664_v17, 0.0  ;;  %vm919_vm0 = vcmp.ge.f32.partialorder %v1664_v17, 0.0 }
  0x14   : > { %v887_v7 = vld [vmem:[%s732_s16] sm:$0xff]  ;;  %v888_v8 = vld [vmem:[%s732_s16 + $0x8] sm:$0xff]  ;;  %v889_v9 = vld [vmem:[%s732_s16 + $0x10] sm:$0xff]  ;;  %966 = vst [vmem:[%s787_s21] sm:$0xff] %v1643_v3  ;;  %v904_v30 = vsub.f32 0.0, %v903_v22  ;;  %v913_v47 = vmax.f32 %v912_v40, 0.0  ;;  %s780_s26 = scalar_lea.vmem %s1734_s8, %s1623_s17  ;;  %s805_s20 = scalar_lea.vmem %s1738_s12, %s1625_s18 }
  0x15   : > { %v845_v10 = vmax.f32 %v844_v6, %v840_v2  ;;  %v890_v11 = vld [vmem:[%s742_s22] sm:$0xff]  ;;  %v891_v12 = vld [vmem:[%s742_s22 + $0x8] sm:$0xff]  ;;  %v892_v13 = vld [vmem:[%s742_s22 + $0x10] sm:$0xff]  ;;  %1455 = vst [vmem:[%s787_s21 + $0x8] sm:$0xff] %v1645_v4  ;;  %s793_s22 = scalar_lea.vmem %s1736_s10, %s1625_s18  ;;  %s766_s25 = scalar_lea.vmem %s1732_s6, %s1625_s18 }
  0x16   : > { %1457 = vst [vmem:[%s787_s21 + $0x10] sm:$0xff] %v1647_v5  ;;  %v893_v14 = vsub.f32 %v887_v7, %v890_v11  ;;  %v894_v15 = vsub.f32 %v888_v8, %v891_v12  ;;  %v895_v16 = vsub.f32 %v889_v9, %v892_v13  ;;  %v1670_v21 = vld [vmem:[%s760_s29] sm:$0xff]  ;;  %v905_v32 = vmul.f32 1.442695, %v904_v30  ;;  %s773_s29 = scalar_lea.vmem %s1733_s7, %s1623_s17  ;;  %s799_s28 = scalar_lea.vmem %s1737_s11, %s1625_s18 }
  0x17   : > { %v846_v18 = vsub.f32 %v838_v0, %v845_v10  ;;  %v847_v19 = vsub.f32 %v839_v1, %v845_v10  ;;  %v848_v20 = vsub.f32 %v840_v2, %v845_v10  ;;  %989 = vst [vmem:[%s817_s19] sm:$0xff] %v1670_v21  ;;  %v924_v61 = vsub.f32 1.0, %v1670_v21  ;;  %s811_s19 = scalar_lea.vmem %s1739_s13, %s1625_s18 }
  0x18   : > { %v896_v23 = vand.u32 2147483647, %v893_v14  ;;  %v897_v24 = vand.u32 2147483647, %v894_v15  ;;  %v898_v25 = vand.u32 2147483647, %v895_v16 }
  0x19   : > { %v849_v26 = vmul.f32 1.442695, %v846_v18  ;;  %v851_v27 = vmul.f32 1.442695, %v847_v19  ;;  %v853_v28 = vmul.f32 1.442695, %v848_v20 }
  0x1a   : > { %v899_v29 = vadd.f32 %v897_v24, %v896_v23  ;;  %v935_v17 = vmul.f32 0.75, %v924_v61 }
  0x1b   : > { %1486 = vpow2.f32 %v849_v26 }
  0x1c   : > { %1488 = vpow2.f32 %v851_v27  ;;  %v900_v31 = vadd.f32 %v899_v29, %v898_v25  ;;  %v934_v27 = vmul.f32 0.25, %v1670_v21 }
  0x1d   : > { %1490 = vpow2.f32 %v853_v28 }
  0x1e   : > { %1492 = vpow2.f32 %v905_v32  ;;  %977 = vst [vmem:[%s793_s22] sm:$0xff] %v900_v31 }
  0x25   : > { %v1487_v33 = vpop.eup %1486 }
  0x26   : > { %v1489_v34 = vpop.eup %1488 }
  0x27   : > { %v1491_v35 = vpop.eup %1490  ;;  %v855_v36 = vadd.f32 %v1489_v34, %v1487_v33 }
  0x28   : > { %v1493_v37 = vpop.eup %1492 }
  0x29   : > { %v856_v38 = vadd.f32 %v1491_v35, %v855_v36  ;;  %v907_v39 = vadd.f32 1.0, %v1493_v37 }
  0x2b   : > { %1494 = vlog2.f32 %v856_v38 }
  0x2c   : > { %1496 = vrcp.f32 %v856_v38 }
  0x2d   : > { %1498 = vlog2.f32 %v907_v39 }
  0x2e   : > { %1500 = vrcp.f32 %v907_v39 }
  0x35   : > { %v1495_v41 = vpop.eup %1494 }
  0x36   : > { %v1497_v42 = vpop.eup %1496  ;;  %v862_v43 = vmul.f32 0.6931472, %v1495_v41 }
  0x37   : > { %v1499_v45 = vpop.eup %1498  ;;  %v858_v46 = vmul.f32 %v1497_v42, %v856_v38 }
  0x38   : > { %v1501_v48 = vpop.eup %1500  ;;  %v863_v49 = vsub.f32 %v846_v18, %v862_v43  ;;  %v866_v50 = vsub.f32 %v847_v19, %v862_v43  ;;  %v870_v51 = vsub.f32 %v848_v20, %v862_v43  ;;  %v909_v52 = vmul.f32 0.6931472, %v1499_v45 }
  0x39   : > { %v859_v53 = vsub.f32 2.0, %v858_v46  ;;  %v916_v54 = vmul.f32 %v1501_v48, %v907_v39 }
  0x3a   : > { %v864_v55 = vmul.f32 %v863_v49, %v1643_v3  ;;  %v867_v56 = vmul.f32 %v866_v50, %v1645_v4  ;;  %v871_v57 = vmul.f32 %v870_v51, %v1647_v5  ;;  %v911_v58 = vadd.f32 %v910_v44, %v909_v52 }
  0x3b   : > { %v860_v59 = vmul.f32 %v1497_v42, %v859_v53  ;;  %v914_v60 = vadd.f32 %v913_v47, %v909_v52  ;;  %v917_v62 = vsub.f32 2.0, %v916_v54 }
  0x3c   : > { %v865_v63 = vmul.f32 0.6, %v864_v55  ;;  %v868_v0 = vmul.f32 0.2, %v867_v56  ;;  %v872_v1 = vmul.f32 0.2, %v871_v57 }
  0x3d   : > { %v879_v2 = vmul.f32 %v1487_v33, %v860_v59  ;;  %v881_v6 = vmul.f32 %v1489_v34, %v860_v59  ;;  %v883_v7 = vmul.f32 %v1491_v35, %v860_v59  ;;  %v922_v8 = vmin.f32 %v914_v60, 100.0 }
  0x3e   : > { %v869_v9 = vadd.f32 %v868_v0, %v865_v63  ;;  %v925_v10 = vmin.f32 %v911_v58, 100.0  ;;  %v918_v11 = vmul.f32 %v1501_v48, %v917_v62  ;;  %v936_v33 = vadd.f32 %v935_v17, %v934_v27 }
  0x3f   : > { %v880_v12 = vmul.f32 %v879_v2, %v1643_v3  ;;  %v882_v13 = vmul.f32 %v881_v6, %v1645_v4  ;;  %v884_v14 = vmul.f32 %v883_v7, %v1647_v5  ;;  %v923_v16 = vmul.f32 %v922_v8, %v1670_v21  ;;  %955 = vst [vmem:[%s780_s26] sm:$0xff] %v879_v2 }
  0x40   : > { %v873_v15 = vadd.f32 %v872_v1, %v869_v9  ;;  %v926_v18 = vmul.f32 %v925_v10, %v924_v61  ;;  %1451 = vst [vmem:[%s780_s26 + $0x8] sm:$0xff] %v881_v6  ;;  %1453 = vst [vmem:[%s780_s26 + $0x10] sm:$0xff] %v883_v7  ;;  %v920_v20 = vmul.f32 %v1493_v37, %v918_v11 }
  0x41   : > { %944 = vst [vmem:[%s773_s29] sm:$0xff] %v880_v12  ;;  %1447 = vst [vmem:[%s773_s29 + $0x8] sm:$0xff] %v882_v13 }
  0x42   : > { %v874_v19 = vsub.f32 0.0, %v873_v15  ;;  %1449 = vst [vmem:[%s773_s29 + $0x10] sm:$0xff] %v884_v14  ;;  %v927_v3 = vadd.f32 %v926_v18, %v923_v16  ;;  %v921_v5 = vsel %vm919_vm0, %v918_v11, %v920_v20 }
  0x43   : > { %v938_v23 = vmul.f32 %v921_v5, %v1670_v21  ;;  %986 = vst [vmem:[%s811_s19] sm:$0xff] %v921_v5 }
  0x44   : > { %v875_v4 = vsub.f32 0.0, %v874_v19  ;;  %v928_v22 = vsub.f32 0.0, %v927_v3 }
  0x45   : > { %983 = vst [vmem:[%s805_s20] sm:$0xff] %v938_v23 }
  0x46   : > { %v876_v24 = vmul.f32 1.442695, %v875_v4  ;;  %v929_v25 = vmul.f32 1.442695, %v928_v22 }
  0x48   : > { %1502 = vpow2.f32 %v876_v24 }
  0x49   : > { %1504 = vpow2.f32 %v929_v25 }
  0x52   : > { %v1503_v26 = vpop.eup %1502 }
  0x53   : > { %v1505_v28 = vpop.eup %1504  ;;  %v878_v29 = vsub.f32 1.0, %v1503_v26 }
  0x54   : > { %v931_v30 = vsub.f32 1.0, %v1505_v28 }
  0x55   : > { %v885_v31 = vmul.f32 %v878_v29, %v878_v29 }
  0x56   : > { %v932_v32 = vmul.f32 %v931_v30, %v931_v30 }
  0x57   : > { %v886_v34 = vmul.f32 %v885_v31, %v874_v19 }
  0x58   : > { %v933_v35 = vmul.f32 %v932_v32, %v927_v3 }
  0x59   : > { %941 = vst [vmem:[%s766_s25] sm:$0xff] %v886_v34 }
  0x5a   : > { %v937_v36 = vmul.f32 %v936_v33, %v933_v35 }
  0x5c   : > { %980 = vst [vmem:[%s799_s28] sm:$0xff] %v937_v36 }
  0x5d PF: > { %s25_s15 = sadd.s32 1, %s1528_s15   ;;  %s1742_s16 = sld [smem:[#allocation2_spill]] }
  0x5e   : > { %p22_p5 = scmp.ge.s32.totalorder %s25_s15, 4   ;;  %s1743_s29 = smov %s1524_s30 }
  0x60   :  { %24 = sbr.rel (!%p22_p5) target bundleno = 2 (0x2), region = 195 }
  0x63   : > { %s1744_s30 = smov %s1742_s16 }

</bundles_post_ra>
